<compile_context>
chip_gen: v5e
topology: v5e:2x2
jax: 0.10.0
libtpu: 0.0.40
codegen_flags: <defaults>
</compile_context>

<pallas_src>
import math
from functools import partial

import jax
import jax.numpy as jnp
from jax import lax
from jax.experimental import pallas as pl
from jax.experimental.pallas import tpu as pltpu


# ----------------------------------------------------------------------------
# Fused multi-head-attention kernel: one batch item per grid step.
# ----------------------------------------------------------------------------
def fused_mha_kernel(x_ref, wq_ref, bq_ref, wk_ref, bk_ref, wv_ref, bv_ref,
                     wo_ref, bo_ref, o_ref, cat_ref, *, n_heads, head_dim):
    x = x_ref[0]                                   # (T, E), compute dtype (bf16)
    cdt = x.dtype                                  # MXU operand dtype

    # Q/K/V projections for ALL heads at once: (T,E)x(E,E), f32 accumulation.
    # 1/sqrt(head_dim) is already folded into wq/bq by the wrapper.
    q = jnp.dot(x, wq_ref[...], preferred_element_type=jnp.float32) + bq_ref[...]
    k = jnp.dot(x, wk_ref[...], preferred_element_type=jnp.float32) + bk_ref[...]
    v = jnp.dot(x, wv_ref[...], preferred_element_type=jnp.float32) + bv_ref[...]
    q = q.astype(cdt)
    k = k.astype(cdt)
    v = v.astype(cdt)

    # Per-head attention (static unroll over heads). Contract q/k on their last
    # (head_dim) axis directly -- no materialized k.T / XLU transpose.
    dn = (((1,), (1,)), ((), ()))
    for h in range(n_heads):
        sl = slice(h * head_dim, (h + 1) * head_dim)
        qh = q[:, sl]                              # (T, hd)
        kh = k[:, sl]
        vh = v[:, sl]
        scores = lax.dot_general(qh, kh, dn,
                                 preferred_element_type=jnp.float32)   # (T, T) f32

        # softmax in f32; reciprocal goes to the EUP slot (free vs VALU divide)
        m = jnp.max(scores, axis=-1, keepdims=True)
        e = jnp.exp(scores - m)
        s = jnp.sum(e, axis=-1, keepdims=True)
        att = e * pl.reciprocal(s, approx=True)

        # TODO(synk): attention-matrix dropout omitted (eval mode / p=0.0).
        head_out = jnp.dot(att.astype(cdt), vh,
                           preferred_element_type=jnp.float32)          # (T, hd)
        cat_ref[:, sl] = head_out.astype(cat_ref.dtype)

    # Fused output projection: (T,E)x(E,E); single lane-dense (T,E) HBM store.
    y = jnp.dot(cat_ref[...], wo_ref[...],
                preferred_element_type=jnp.float32) + bo_ref[...]
    # TODO(synk): residual dropout omitted (eval mode / p=0.0).
    o_ref[0] = y.astype(o_ref.dtype)


# ----------------------------------------------------------------------------
# Wrapper: stack per-head params, fold the attention scale, cast to bf16,
# and launch the single fused pallas_call.
# ----------------------------------------------------------------------------
def prepare_fused_params(params, compute_dtype=jnp.bfloat16):
    """(H,E,hd) per-head weights -> (E, H*hd)=(E,E); fold 1/sqrt(hd) into wq/bq;
    cast weights to the MXU compute dtype. Biases stay f32 (they are added to
    the f32 matmul accumulators)."""
    H, E, hd = params["wq"].shape
    assert H * hd == E
    scale = 1.0 / math.sqrt(hd)

    def stack_w(w):                                   # (H, E, hd) -> (E, E)
        return jnp.transpose(w, (1, 0, 2)).reshape(E, H * hd)

    def stack_b(b):                                   # (H, 1, hd) -> (1, E)
        return b.reshape(1, H * hd)

    return {
        "wq": (stack_w(params["wq"]) * scale).astype(compute_dtype),
        "bq": (stack_b(params["bq"]) * scale).astype(jnp.float32),
        "wk": stack_w(params["wk"]).astype(compute_dtype),
        "bk": stack_b(params["bk"]).astype(jnp.float32),
        "wv": stack_w(params["wv"]).astype(compute_dtype),
        "bv": stack_b(params["bv"]).astype(jnp.float32),
        "wo": params["wo"].astype(compute_dtype),
        "bo": params["bo"].astype(jnp.float32),
    }


def multi_head_attn_forward(x, params, *, compute_dtype=jnp.bfloat16):
    """x: (B, T, E) f32. Returns (B, T, E) in x.dtype."""
    B, T, E = x.shape
    H, _, hd = params["wq"].shape
    out_dtype = x.dtype

    fp = prepare_fused_params(params, compute_dtype)
    xc = x.astype(compute_dtype)

    # Advisory cost estimate so XLA schedules surrounding ops sensibly.
    flops = (4 * 2 * B * T * E * E               # q/k/v + output projections
             + 2 * B * H * 2 * T * T * hd)       # scores + att @ v
    transcendentals = B * H * T * T              # exp in softmax
    isz = jnp.dtype(compute_dtype).itemsize
    bytes_accessed = (B * T * E * isz            # x
                      + 4 * E * E * isz          # stacked weights
                      + 4 * E * 4                # f32 biases
                      + B * T * E * jnp.dtype(out_dtype).itemsize)  # output

    w_spec = pl.BlockSpec((E, E), lambda b: (0, 0))
    b_spec = pl.BlockSpec((1, E), lambda b: (0, 0))

    return pl.pallas_call(
        partial(fused_mha_kernel, n_heads=H, head_dim=hd),
        out_shape=jax.ShapeDtypeStruct((B, T, E), out_dtype),
        grid_spec=pltpu.PrefetchScalarGridSpec(
            num_scalar_prefetch=0,
            grid=(B,),
            in_specs=[
                pl.BlockSpec((1, T, E), lambda b: (b, 0, 0)),   # x
                w_spec, b_spec,                                 # wq, bq
                w_spec, b_spec,                                 # wk, bk
                w_spec, b_spec,                                 # wv, bv
                w_spec, b_spec,                                 # wo, bo
            ],
            out_specs=pl.BlockSpec((1, T, E), lambda b: (b, 0, 0)),
            scratch_shapes=[pltpu.VMEM((T, E), compute_dtype)],  # concat'd heads
        ),
        compiler_params=pltpu.CompilerParams(
            # Batch axis is parallel -> both TensorCores used on v7x.
            dimension_semantics=("parallel",),
            # Full-sequence blocks; raise beyond the 16/32 MiB default scoped
            # limit so transformer-sized T/E still fit (48 MiB is safe on
            # v5e/v6e/v7x).
            # TODO(synk): for long sequences (esp. v7x, 64 MiB VMEM), tile T/S
            # with an online-softmax (flash) accumulator instead of the full
            # (T,T) score matrix.
            vmem_limit_bytes=48 * 1024 * 1024,
        ),
        cost_estimate=pl.CostEstimate(
            flops=flops,
            transcendentals=transcendentals,
            bytes_accessed=bytes_accessed),
    )(xc, fp["wq"], fp["bq"], fp["wk"], fp["bk"], fp["wv"], fp["bv"],
      fp["wo"], fp["bo"])


# ----------------------------------------------------------------------------
# Deterministic parameter init (per-head layout matching the PyTorch module;
# weights stored as (in_features, out_features)).
# ----------------------------------------------------------------------------
def init_params(key, embedding_dim, n_heads):
    head_dim = embedding_dim // n_heads
    keys = jax.random.split(key, 8)
    scale = 1.0 / math.sqrt(embedding_dim)
    return {
        "wq": jax.random.uniform(keys[0], (n_heads, embedding_dim, head_dim),
                                 jnp.float32, -scale, scale),
        "bq": jax.random.uniform(keys[1], (n_heads, 1, head_dim),
                                 jnp.float32, -scale, scale),
        "wk": jax.random.uniform(keys[2], (n_heads, embedding_dim, head_dim),
                                 jnp.float32, -scale, scale),
        "bk": jax.random.uniform(keys[3], (n_heads, 1, head_dim),
                                 jnp.float32, -scale, scale),
        "wv": jax.random.uniform(keys[4], (n_heads, embedding_dim, head_dim),
                                 jnp.float32, -scale, scale),
        "bv": jax.random.uniform(keys[5], (n_heads, 1, head_dim),
                                 jnp.float32, -scale, scale),
        "wo": jax.random.uniform(keys[6], (embedding_dim, embedding_dim),
                                 jnp.float32, -scale, scale),
        "bo": jax.random.uniform(keys[7], (1, embedding_dim),
                                 jnp.float32, -scale, scale),
    }


# Pure-JAX f32 reference for correctness check (mirrors the PyTorch module).
def reference_forward(x, params):
    H = params["wq"].shape[0]
    hd = params["wq"].shape[2]
    outs = []
    for h in range(H):
        q = x @ params["wq"][h] + params["bq"][h]
        k = x @ params["wk"][h] + params["bk"][h]
        v = x @ params["wv"][h] + params["bv"][h]
        scores = jnp.einsum("btd,bsd->bts", q, k) / math.sqrt(hd)
        att = jax.nn.softmax(scores, axis=-1)
        outs.append(jnp.einsum("bts,bsd->btd", att, v))
    cat = jnp.concatenate(outs, axis=-1)
    return cat @ params["wo"] + params["bo"]


if __name__ == "__main__":
    # Config: embedding_dim=32, n_heads=4 (head_dim=8), block_size=seq=8, dropout=0.0
    B, T, E, H = 2, 8, 32, 4

    key = jax.random.PRNGKey(0)
    kx, kp = jax.random.split(key)
    x = jax.random.normal(kx, (B, T, E), dtype=jnp.float32)
    params = init_params(kp, E, H)

    out = multi_head_attn_forward(x, params)
    out = jax.block_until_ready(out)

    ref = reference_forward(x, params)
    assert out.shape == (B, T, E), out.shape
    # bf16 MXU operands + approx reciprocal -> loose-but-safe tolerance vs f32 ref.
    assert jnp.allclose(out, ref, atol=5e-2, rtol=5e-2), "mismatch vs reference"

    print("KERNEL_OK")
</pallas_src>

<mosaic_0001>
module attributes {stable_mosaic.version = 11 : i64} {
  func.func @fused_mha_kernel(%arg0: i32, %arg1: memref<1x8x32xbf16, #tpu.memory_space<vmem>>, %arg2: memref<32x32xbf16, #tpu.memory_space<vmem>>, %arg3: memref<1x32xf32, #tpu.memory_space<vmem>>, %arg4: memref<32x32xbf16, #tpu.memory_space<vmem>>, %arg5: memref<1x32xf32, #tpu.memory_space<vmem>>, %arg6: memref<32x32xbf16, #tpu.memory_space<vmem>>, %arg7: memref<1x32xf32, #tpu.memory_space<vmem>>, %arg8: memref<32x32xbf16, #tpu.memory_space<vmem>>, %arg9: memref<1x32xf32, #tpu.memory_space<vmem>>, %arg10: memref<1x8x32xf32, #tpu.memory_space<vmem>>, %arg11: memref<8x32xbf16, #tpu.memory_space<vmem>>) attributes {dimension_semantics = [#tpu.dimension_semantics<parallel>], iteration_bounds = array<i64: 2>, scalar_prefetch = 0 : i64, scratch_operands = 1 : i64, tpu.core_type = #tpu.core_type<tc>, window_params = [{transform_indices = @transform_0, window_bounds = array<i64: 1, 8, 32>}, {pipeline_mode = #tpu.pipeline_mode<synchronous>, transform_indices = @transform_1, window_bounds = array<i64: 32, 32>}, {pipeline_mode = #tpu.pipeline_mode<synchronous>, transform_indices = @transform_2, window_bounds = array<i64: 1, 32>}, {pipeline_mode = #tpu.pipeline_mode<synchronous>, transform_indices = @transform_3, window_bounds = array<i64: 32, 32>}, {pipeline_mode = #tpu.pipeline_mode<synchronous>, transform_indices = @transform_4, window_bounds = array<i64: 1, 32>}, {pipeline_mode = #tpu.pipeline_mode<synchronous>, transform_indices = @transform_5, window_bounds = array<i64: 32, 32>}, {pipeline_mode = #tpu.pipeline_mode<synchronous>, transform_indices = @transform_6, window_bounds = array<i64: 1, 32>}, {pipeline_mode = #tpu.pipeline_mode<synchronous>, transform_indices = @transform_7, window_bounds = array<i64: 32, 32>}, {pipeline_mode = #tpu.pipeline_mode<synchronous>, transform_indices = @transform_8, window_bounds = array<i64: 1, 32>}, {transform_indices = @transform_9, window_bounds = array<i64: 1, 8, 32>}]} {
    %c0 = arith.constant 0 : index
    %c0_0 = arith.constant 0 : index
    %c0_1 = arith.constant 0 : index
    %0 = vector.load %arg1[%c0, %c0_0, %c0_1] : memref<1x8x32xbf16, #tpu.memory_space<vmem>>, vector<1x8x32xbf16>
    %1 = vector.shape_cast %0 : vector<1x8x32xbf16> to vector<8x32xbf16>
    %c0_2 = arith.constant 0 : index
    %c0_3 = arith.constant 0 : index
    %2 = vector.load %arg2[%c0_2, %c0_3] : memref<32x32xbf16, #tpu.memory_space<vmem>>, vector<32x32xbf16>
    %cst = arith.constant dense<0.000000e+00> : vector<8x32xf32>
    %3 = tpu.matmul %1, %2, %cst {dimension_numbers = #tpu.dot_dimension_numbers<[1], [0], [0], [1], [0, 0, 1, 1], [], []>} : vector<8x32xbf16>, vector<32x32xbf16>, vector<8x32xf32> -> vector<8x32xf32>
    %c0_4 = arith.constant 0 : index
    %c0_5 = arith.constant 0 : index
    %4 = vector.load %arg3[%c0_4, %c0_5] : memref<1x32xf32, #tpu.memory_space<vmem>>, vector<1x32xf32>
    %5 = vector.broadcast %4 : vector<1x32xf32> to vector<8x32xf32>
    %6 = arith.addf %3, %5 : vector<8x32xf32>
    %c0_6 = arith.constant 0 : index
    %c0_7 = arith.constant 0 : index
    %7 = vector.load %arg4[%c0_6, %c0_7] : memref<32x32xbf16, #tpu.memory_space<vmem>>, vector<32x32xbf16>
    %cst_8 = arith.constant dense<0.000000e+00> : vector<8x32xf32>
    %8 = tpu.matmul %1, %7, %cst_8 {dimension_numbers = #tpu.dot_dimension_numbers<[1], [0], [0], [1], [0, 0, 1, 1], [], []>} : vector<8x32xbf16>, vector<32x32xbf16>, vector<8x32xf32> -> vector<8x32xf32>
    %c0_9 = arith.constant 0 : index
    %c0_10 = arith.constant 0 : index
    %9 = vector.load %arg5[%c0_9, %c0_10] : memref<1x32xf32, #tpu.memory_space<vmem>>, vector<1x32xf32>
    %10 = vector.broadcast %9 : vector<1x32xf32> to vector<8x32xf32>
    %11 = arith.addf %8, %10 : vector<8x32xf32>
    %c0_11 = arith.constant 0 : index
    %c0_12 = arith.constant 0 : index
    %12 = vector.load %arg6[%c0_11, %c0_12] : memref<32x32xbf16, #tpu.memory_space<vmem>>, vector<32x32xbf16>
    %cst_13 = arith.constant dense<0.000000e+00> : vector<8x32xf32>
    %13 = tpu.matmul %1, %12, %cst_13 {dimension_numbers = #tpu.dot_dimension_numbers<[1], [0], [0], [1], [0, 0, 1, 1], [], []>} : vector<8x32xbf16>, vector<32x32xbf16>, vector<8x32xf32> -> vector<8x32xf32>
    %c0_14 = arith.constant 0 : index
    %c0_15 = arith.constant 0 : index
    %14 = vector.load %arg7[%c0_14, %c0_15] : memref<1x32xf32, #tpu.memory_space<vmem>>, vector<1x32xf32>
    %15 = vector.broadcast %14 : vector<1x32xf32> to vector<8x32xf32>
    %16 = arith.addf %13, %15 : vector<8x32xf32>
    %17 = arith.truncf %6 : vector<8x32xf32> to vector<8x32xbf16>
    %18 = arith.truncf %11 : vector<8x32xf32> to vector<8x32xbf16>
    %19 = arith.truncf %16 : vector<8x32xf32> to vector<8x32xbf16>
    %20 = vector.extract_strided_slice %17 {offsets = [0, 0], sizes = [8, 8], strides = [1, 1]} : vector<8x32xbf16> to vector<8x8xbf16>
    %21 = vector.extract_strided_slice %18 {offsets = [0, 0], sizes = [8, 8], strides = [1, 1]} : vector<8x32xbf16> to vector<8x8xbf16>
    %22 = vector.extract_strided_slice %19 {offsets = [0, 0], sizes = [8, 8], strides = [1, 1]} : vector<8x32xbf16> to vector<8x8xbf16>
    %cst_16 = arith.constant dense<0.000000e+00> : vector<8x8xf32>
    %23 = tpu.matmul %20, %21, %cst_16 {dimension_numbers = #tpu.dot_dimension_numbers<[1], [1], [0], [0], [0, 0, 1, 0], [], []>} : vector<8x8xbf16>, vector<8x8xbf16>, vector<8x8xf32> -> vector<8x8xf32>
    %cst_17 = arith.constant dense<0xFF800000> : vector<8xf32>
    %24 = vector.multi_reduction <maximumf>, %23, %cst_17 [1] : vector<8x8xf32> to vector<8xf32>
    %25 = vector.shape_cast %24 : vector<8xf32> to vector<8x1xf32>
    %26 = vector.broadcast %25 : vector<8x1xf32> to vector<8x8xf32>
    %27 = arith.subf %23, %26 : vector<8x8xf32>
    %28 = math.exp %27 : vector<8x8xf32>
    %cst_18 = arith.constant dense<0.000000e+00> : vector<8xf32>
    %29 = vector.multi_reduction <add>, %28, %cst_18 [1] : vector<8x8xf32> to vector<8xf32>
    %30 = vector.shape_cast %29 : vector<8xf32> to vector<8x1xf32>
    %31 = tpu.reciprocal %30 {approx = true} : vector<8x1xf32> -> vector<8x1xf32>
    %32 = vector.broadcast %31 : vector<8x1xf32> to vector<8x8xf32>
    %33 = arith.mulf %28, %32 : vector<8x8xf32>
    %34 = arith.truncf %33 : vector<8x8xf32> to vector<8x8xbf16>
    %cst_19 = arith.constant dense<0.000000e+00> : vector<8x8xf32>
    %35 = tpu.matmul %34, %22, %cst_19 {dimension_numbers = #tpu.dot_dimension_numbers<[1], [0], [0], [1], [0, 0, 1, 1], [], []>} : vector<8x8xbf16>, vector<8x8xbf16>, vector<8x8xf32> -> vector<8x8xf32>
    %36 = arith.truncf %35 : vector<8x8xf32> to vector<8x8xbf16>
    %c0_20 = arith.constant 0 : index
    %c0_21 = arith.constant 0 : index
    %37 = vector.load %arg11[%c0_20, %c0_21] : memref<8x32xbf16, #tpu.memory_space<vmem>>, vector<8x8xbf16>
    tpu.vector_store %arg11[%c0_20, %c0_21], %36 {strides = array<i32>} : memref<8x32xbf16, #tpu.memory_space<vmem>>, vector<8x8xbf16>,
    %38 = vector.extract_strided_slice %17 {offsets = [0, 8], sizes = [8, 8], strides = [1, 1]} : vector<8x32xbf16> to vector<8x8xbf16>
    %39 = vector.extract_strided_slice %18 {offsets = [0, 8], sizes = [8, 8], strides = [1, 1]} : vector<8x32xbf16> to vector<8x8xbf16>
    %40 = vector.extract_strided_slice %19 {offsets = [0, 8], sizes = [8, 8], strides = [1, 1]} : vector<8x32xbf16> to vector<8x8xbf16>
    %cst_22 = arith.constant dense<0.000000e+00> : vector<8x8xf32>
    %41 = tpu.matmul %38, %39, %cst_22 {dimension_numbers = #tpu.dot_dimension_numbers<[1], [1], [0], [0], [0, 0, 1, 0], [], []>} : vector<8x8xbf16>, vector<8x8xbf16>, vector<8x8xf32> -> vector<8x8xf32>
    %cst_23 = arith.constant dense<0xFF800000> : vector<8xf32>
    %42 = vector.multi_reduction <maximumf>, %41, %cst_23 [1] : vector<8x8xf32> to vector<8xf32>
    %43 = vector.shape_cast %42 : vector<8xf32> to vector<8x1xf32>
    %44 = vector.broadcast %43 : vector<8x1xf32> to vector<8x8xf32>
    %45 = arith.subf %41, %44 : vector<8x8xf32>
    %46 = math.exp %45 : vector<8x8xf32>
    %cst_24 = arith.constant dense<0.000000e+00> : vector<8xf32>
    %47 = vector.multi_reduction <add>, %46, %cst_24 [1] : vector<8x8xf32> to vector<8xf32>
    %48 = vector.shape_cast %47 : vector<8xf32> to vector<8x1xf32>
    %49 = tpu.reciprocal %48 {approx = true} : vector<8x1xf32> -> vector<8x1xf32>
    %50 = vector.broadcast %49 : vector<8x1xf32> to vector<8x8xf32>
    %51 = arith.mulf %46, %50 : vector<8x8xf32>
    %52 = arith.truncf %51 : vector<8x8xf32> to vector<8x8xbf16>
    %cst_25 = arith.constant dense<0.000000e+00> : vector<8x8xf32>
    %53 = tpu.matmul %52, %40, %cst_25 {dimension_numbers = #tpu.dot_dimension_numbers<[1], [0], [0], [1], [0, 0, 1, 1], [], []>} : vector<8x8xbf16>, vector<8x8xbf16>, vector<8x8xf32> -> vector<8x8xf32>
    %54 = arith.truncf %53 : vector<8x8xf32> to vector<8x8xbf16>
    %c0_26 = arith.constant 0 : index
    %c8 = arith.constant 8 : index
    %55 = vector.load %arg11[%c0_26, %c8] : memref<8x32xbf16, #tpu.memory_space<vmem>>, vector<8x8xbf16>
    tpu.vector_store %arg11[%c0_26, %c8], %54 {strides = array<i32>} : memref<8x32xbf16, #tpu.memory_space<vmem>>, vector<8x8xbf16>,
    %56 = vector.extract_strided_slice %17 {offsets = [0, 16], sizes = [8, 8], strides = [1, 1]} : vector<8x32xbf16> to vector<8x8xbf16>
    %57 = vector.extract_strided_slice %18 {offsets = [0, 16], sizes = [8, 8], strides = [1, 1]} : vector<8x32xbf16> to vector<8x8xbf16>
    %58 = vector.extract_strided_slice %19 {offsets = [0, 16], sizes = [8, 8], strides = [1, 1]} : vector<8x32xbf16> to vector<8x8xbf16>
    %cst_27 = arith.constant dense<0.000000e+00> : vector<8x8xf32>
    %59 = tpu.matmul %56, %57, %cst_27 {dimension_numbers = #tpu.dot_dimension_numbers<[1], [1], [0], [0], [0, 0, 1, 0], [], []>} : vector<8x8xbf16>, vector<8x8xbf16>, vector<8x8xf32> -> vector<8x8xf32>
    %cst_28 = arith.constant dense<0xFF800000> : vector<8xf32>
    %60 = vector.multi_reduction <maximumf>, %59, %cst_28 [1] : vector<8x8xf32> to vector<8xf32>
    %61 = vector.shape_cast %60 : vector<8xf32> to vector<8x1xf32>
    %62 = vector.broadcast %61 : vector<8x1xf32> to vector<8x8xf32>
    %63 = arith.subf %59, %62 : vector<8x8xf32>
    %64 = math.exp %63 : vector<8x8xf32>
    %cst_29 = arith.constant dense<0.000000e+00> : vector<8xf32>
    %65 = vector.multi_reduction <add>, %64, %cst_29 [1] : vector<8x8xf32> to vector<8xf32>
    %66 = vector.shape_cast %65 : vector<8xf32> to vector<8x1xf32>
    %67 = tpu.reciprocal %66 {approx = true} : vector<8x1xf32> -> vector<8x1xf32>
    %68 = vector.broadcast %67 : vector<8x1xf32> to vector<8x8xf32>
    %69 = arith.mulf %64, %68 : vector<8x8xf32>
    %70 = arith.truncf %69 : vector<8x8xf32> to vector<8x8xbf16>
    %cst_30 = arith.constant dense<0.000000e+00> : vector<8x8xf32>
    %71 = tpu.matmul %70, %58, %cst_30 {dimension_numbers = #tpu.dot_dimension_numbers<[1], [0], [0], [1], [0, 0, 1, 1], [], []>} : vector<8x8xbf16>, vector<8x8xbf16>, vector<8x8xf32> -> vector<8x8xf32>
    %72 = arith.truncf %71 : vector<8x8xf32> to vector<8x8xbf16>
    %c0_31 = arith.constant 0 : index
    %c16 = arith.constant 16 : index
    %73 = vector.load %arg11[%c0_31, %c16] : memref<8x32xbf16, #tpu.memory_space<vmem>>, vector<8x8xbf16>
    tpu.vector_store %arg11[%c0_31, %c16], %72 {strides = array<i32>} : memref<8x32xbf16, #tpu.memory_space<vmem>>, vector<8x8xbf16>,
    %74 = vector.extract_strided_slice %17 {offsets = [0, 24], sizes = [8, 8], strides = [1, 1]} : vector<8x32xbf16> to vector<8x8xbf16>
    %75 = vector.extract_strided_slice %18 {offsets = [0, 24], sizes = [8, 8], strides = [1, 1]} : vector<8x32xbf16> to vector<8x8xbf16>
    %76 = vector.extract_strided_slice %19 {offsets = [0, 24], sizes = [8, 8], strides = [1, 1]} : vector<8x32xbf16> to vector<8x8xbf16>
    %cst_32 = arith.constant dense<0.000000e+00> : vector<8x8xf32>
    %77 = tpu.matmul %74, %75, %cst_32 {dimension_numbers = #tpu.dot_dimension_numbers<[1], [1], [0], [0], [0, 0, 1, 0], [], []>} : vector<8x8xbf16>, vector<8x8xbf16>, vector<8x8xf32> -> vector<8x8xf32>
    %cst_33 = arith.constant dense<0xFF800000> : vector<8xf32>
    %78 = vector.multi_reduction <maximumf>, %77, %cst_33 [1] : vector<8x8xf32> to vector<8xf32>
    %79 = vector.shape_cast %78 : vector<8xf32> to vector<8x1xf32>
    %80 = vector.broadcast %79 : vector<8x1xf32> to vector<8x8xf32>
    %81 = arith.subf %77, %80 : vector<8x8xf32>
    %82 = math.exp %81 : vector<8x8xf32>
    %cst_34 = arith.constant dense<0.000000e+00> : vector<8xf32>
    %83 = vector.multi_reduction <add>, %82, %cst_34 [1] : vector<8x8xf32> to vector<8xf32>
    %84 = vector.shape_cast %83 : vector<8xf32> to vector<8x1xf32>
    %85 = tpu.reciprocal %84 {approx = true} : vector<8x1xf32> -> vector<8x1xf32>
    %86 = vector.broadcast %85 : vector<8x1xf32> to vector<8x8xf32>
    %87 = arith.mulf %82, %86 : vector<8x8xf32>
    %88 = arith.truncf %87 : vector<8x8xf32> to vector<8x8xbf16>
    %cst_35 = arith.constant dense<0.000000e+00> : vector<8x8xf32>
    %89 = tpu.matmul %88, %76, %cst_35 {dimension_numbers = #tpu.dot_dimension_numbers<[1], [0], [0], [1], [0, 0, 1, 1], [], []>} : vector<8x8xbf16>, vector<8x8xbf16>, vector<8x8xf32> -> vector<8x8xf32>
    %90 = arith.truncf %89 : vector<8x8xf32> to vector<8x8xbf16>
    %c0_36 = arith.constant 0 : index
    %c24 = arith.constant 24 : index
    %91 = vector.load %arg11[%c0_36, %c24] : memref<8x32xbf16, #tpu.memory_space<vmem>>, vector<8x8xbf16>
    tpu.vector_store %arg11[%c0_36, %c24], %90 {strides = array<i32>} : memref<8x32xbf16, #tpu.memory_space<vmem>>, vector<8x8xbf16>,
    %c0_37 = arith.constant 0 : index
    %c0_38 = arith.constant 0 : index
    %92 = vector.load %arg11[%c0_37, %c0_38] : memref<8x32xbf16, #tpu.memory_space<vmem>>, vector<8x32xbf16>
    %c0_39 = arith.constant 0 : index
    %c0_40 = arith.constant 0 : index
    %93 = vector.load %arg8[%c0_39, %c0_40] : memref<32x32xbf16, #tpu.memory_space<vmem>>, vector<32x32xbf16>
    %cst_41 = arith.constant dense<0.000000e+00> : vector<8x32xf32>
    %94 = tpu.matmul %92, %93, %cst_41 {dimension_numbers = #tpu.dot_dimension_numbers<[1], [0], [0], [1], [0, 0, 1, 1], [], []>} : vector<8x32xbf16>, vector<32x32xbf16>, vector<8x32xf32> -> vector<8x32xf32>
    %c0_42 = arith.constant 0 : index
    %c0_43 = arith.constant 0 : index
    %95 = vector.load %arg9[%c0_42, %c0_43] : memref<1x32xf32, #tpu.memory_space<vmem>>, vector<1x32xf32>
    %96 = vector.broadcast %95 : vector<1x32xf32> to vector<8x32xf32>
    %97 = arith.addf %94, %96 : vector<8x32xf32>
    %c0_44 = arith.constant 0 : index
    %c0_45 = arith.constant 0 : index
    %c0_46 = arith.constant 0 : index
    %98 = vector.load %arg10[%c0_44, %c0_45, %c0_46] : memref<1x8x32xf32, #tpu.memory_space<vmem>>, vector<1x8x32xf32>
    %99 = vector.shape_cast %98 : vector<1x8x32xf32> to vector<8x32xf32>
    %100 = vector.shape_cast %97 : vector<8x32xf32> to vector<1x8x32xf32>
    tpu.vector_store %arg10[%c0_44, %c0_45, %c0_46], %100 {strides = array<i32>} : memref<1x8x32xf32, #tpu.memory_space<vmem>>, vector<1x8x32xf32>,
    return
  }
  func.func @transform_0(%arg0: i32) -> (i32, i32, i32) {
    %c0_i32 = arith.constant 0 : i32
    %c0_i32_0 = arith.constant 0 : i32
    %c0_i32_1 = arith.constant 0 : i32
    return %arg0, %c0_i32, %c0_i32_0 : i32, i32, i32
  }
  func.func @transform_1(%arg0: i32) -> (i32, i32) {
    %c0_i32 = arith.constant 0 : i32
    %c0_i32_0 = arith.constant 0 : i32
    %c0_i32_1 = arith.constant 0 : i32
    return %c0_i32, %c0_i32_0 : i32, i32
  }
  func.func @transform_2(%arg0: i32) -> (i32, i32) {
    %c0_i32 = arith.constant 0 : i32
    %c0_i32_0 = arith.constant 0 : i32
    %c0_i32_1 = arith.constant 0 : i32
    return %c0_i32, %c0_i32_0 : i32, i32
  }
  func.func @transform_3(%arg0: i32) -> (i32, i32) {
    %c0_i32 = arith.constant 0 : i32
    %c0_i32_0 = arith.constant 0 : i32
    %c0_i32_1 = arith.constant 0 : i32
    return %c0_i32, %c0_i32_0 : i32, i32
  }
  func.func @transform_4(%arg0: i32) -> (i32, i32) {
    %c0_i32 = arith.constant 0 : i32
    %c0_i32_0 = arith.constant 0 : i32
    %c0_i32_1 = arith.constant 0 : i32
    return %c0_i32, %c0_i32_0 : i32, i32
  }
  func.func @transform_5(%arg0: i32) -> (i32, i32) {
    %c0_i32 = arith.constant 0 : i32
    %c0_i32_0 = arith.constant 0 : i32
    %c0_i32_1 = arith.constant 0 : i32
    return %c0_i32, %c0_i32_0 : i32, i32
  }
  func.func @transform_6(%arg0: i32) -> (i32, i32) {
    %c0_i32 = arith.constant 0 : i32
    %c0_i32_0 = arith.constant 0 : i32
    %c0_i32_1 = arith.constant 0 : i32
    return %c0_i32, %c0_i32_0 : i32, i32
  }
  func.func @transform_7(%arg0: i32) -> (i32, i32) {
    %c0_i32 = arith.constant 0 : i32
    %c0_i32_0 = arith.constant 0 : i32
    %c0_i32_1 = arith.constant 0 : i32
    return %c0_i32, %c0_i32_0 : i32, i32
  }
  func.func @transform_8(%arg0: i32) -> (i32, i32) {
    %c0_i32 = arith.constant 0 : i32
    %c0_i32_0 = arith.constant 0 : i32
    %c0_i32_1 = arith.constant 0 : i32
    return %c0_i32, %c0_i32_0 : i32, i32
  }
  func.func @transform_9(%arg0: i32) -> (i32, i32, i32) {
    %c0_i32 = arith.constant 0 : i32
    %c0_i32_0 = arith.constant 0 : i32
    %c0_i32_1 = arith.constant 0 : i32
    return %arg0, %c0_i32, %c0_i32_0 : i32, i32, i32
  }
}

</mosaic_0001>

<bundles_post_ra>
// kernel: tpu_custom_call.1
= control target key start
LH: loop header
LB: loop body
LE: loop exit
PB: predicated region body
PF: predicated region fallthrough
CT: control target
= control target key end

     0   :  { %s1632_s0 = inlined_call_operand.hbm [shape: bf16[2,8,32], index: 0, kind: input, shape index: {}]   ;;  %s1633_s1 = inlined_call_operand.hbm [shape: bf16[32,32], index: 1, kind: input, shape index: {}]   ;;  %s1634_s2 = inlined_call_operand.vmem [shape: f32[1,32], index: 2, kind: input, shape index: {}]   ;;  %s1635_s3 = inlined_call_operand.hbm [shape: bf16[32,32], index: 3, kind: input, shape index: {}]   ;;  %s1636_s4 = inlined_call_operand.vmem [shape: f32[1,32], index: 4, kind: input, shape index: {}]   ;;  %s1637_s5 = inlined_call_operand.hbm [shape: bf16[32,32], index: 5, kind: input, shape index: {}]   ;;  %s1638_s6 = inlined_call_operand.vmem [shape: f32[1,32], index: 6, kind: input, shape index: {}]   ;;  %s1639_s7 = inlined_call_operand.hbm [shape: bf16[32,32], index: 7, kind: input, shape index: {}]   ;;  %s1640_s8 = inlined_call_operand.vmem [shape: f32[1,32], index: 8, kind: input, shape index: {}]   ;;  %s1641_s9 = inlined_call_operand.hbm [shape: f32[2,8,32], index: 9, kind: output, shape index: {}]  }
   0x1   :  { %1642 = sst [smem:[#allocation17_spill]] %s1633_s1 }
   0x2   :  { %1643 = sst [smem:[#allocation18_spill]] %s1635_s3 }
   0x3   :  { %1644 = sst [smem:[#allocation19_spill]] %s1637_s5 }
   0x4   :  { %1645 = sst [smem:[#allocation20_spill]] %s1639_s7 }
   0x5   :  { %14 = vsyncpa [#allocation4], 0 }
   0x6   :  { %16 = vsyncpa [#allocation4 + $0x1], 0 }
   0x7   :  { %17 = vsyncpa [#allocation7], 0 }
   0x8   :  { %18 = vsyncpa [#allocation10], 0 }
   0x9   :  { %19 = vsyncpa [#allocation5], 0 }
   0xa   :  { %21 = vsyncpa [#allocation5 + $0x1], 0  ;;  %s1414_s30 = smov 0   ;;  %s1416_s10 = smov 0  }
   0xb   :  { %s1418_s11 = smov 0   ;;  %s1420_s12 = smov 0  }
   0xc LB: > { %s1646_s1 = sld [smem:[#allocation17_spill]]  ;;  %s1438_s16 = sadd.s32 4294967295, %s1350_s12   ;;  %s1350_s12 = sphi %s1420_s12, %s1661_s12   ;;  %s1346_s11 = sphi %s1418_s11, %s1660_s11   ;;  %s1342_s10 = sphi %s1416_s10, %s1659_s10   ;;  %s1338_s30 = sphi %s1414_s30, %s1658_s30  }
   0xd   : > { %p940_p0 = scmp.ge.s32.totalorder %s1350_s12, 1  ;;  %p48_p1 = scmp.eq.s32.totalorder %s1438_s16, 0 }
   0xe   : > { %p252_p2 = scmp.lt.s32.totalorder %s1350_s12, 3  ;;  %s1352_s18 = smov [#allocation6]  }
   0xf   : > { %s265_s19 = sshll.u32 %s1352_s18, 4  ;;  %s1648_s5 = sld [smem:[#allocation19_spill]]  ;;  %s266_s19 = int_to_ptr.vmem [resolvable:$true] %s265_s19 }
  0x10   : > { %p1443_p3 = pnand %p940_p0, %p252_p2  ;;  %s1650_s3 = sld [smem:[#allocation18_spill]] }
  0x11   : > { %s1353_s27 = smov [#allocation9]   ;;  %s1354_s29 = smov 64  }
  0x12   : > { %s263_s15 = sshll.u32 %s1646_s1, 4  ;;  %p1031_p4 = pneg %p1443_p3  ;;  %s264_s15 = int_to_ptr.hbm [resolvable:$true] %s263_s15 }
  0x13   : > { %s299_s28 = sshll.u32 %s1353_s27, 4  ;;  %s1355_s13 = smov 4   ;;  %s300_s28 = int_to_ptr.vmem [resolvable:$true] %s299_s28 }
  0x14   : > { %p1455_p6 = pnand %p1031_p4, %p48_p1  ;;  %s1651_s7 = sld [smem:[#allocation20_spill]] }
  0x15   : > { %s297_s22 = sshll.u32 %s1648_s5, 4  ;;  %s1356_s21 = smov [#allocation8]   ;;  %s298_s22 = int_to_ptr.hbm [resolvable:$true] %s297_s22 }
  0x16   : > { %s280_s26 = sshll.u32 %s1650_s3, 4  ;;  %s282_s24 = sshll.u32 %s1356_s21, 4  ;;  %s281_s26 = int_to_ptr.hbm [resolvable:$true] %s280_s26  ;;  %s283_s24 = int_to_ptr.vmem [resolvable:$true] %s282_s24 }
  0x17   : > { %1034 = dma.hbm_to_vmem [thread:$0]  (!%p1455_p6), %s264_s15, 256, %s266_s19, [#allocation7], %s1354_s29, %s1354_s29, %s1355_s13  }
  0x18   : > { %1040 = dma.hbm_to_vmem [thread:$0]  (!%p1455_p6), %s298_s22, 256, %s300_s28, [#allocation10], %s1354_s29, %s1354_s29, %s1355_s13  }
  0x19   : > { %1037 = dma.hbm_to_vmem [thread:$0]  (!%p1455_p6), %s281_s26, 256, %s283_s24, [#allocation7], %s1354_s29, %s1354_s29, %s1355_s13  }
  0x1a   : > { %s314_s20 = sshll.u32 %s1651_s7, 4  ;;  %s1357_s15 = smov [#allocation11]   ;;  %s315_s20 = int_to_ptr.hbm [resolvable:$true] %s314_s20 }
  0x1b   : > { %s316_s19 = sshll.u32 %s1357_s15, 4  ;;  %s939_s22 = sadd.s32 4294967294, %s1350_s12   ;;  %s317_s19 = int_to_ptr.vmem [resolvable:$true] %s316_s19 }
  0x1c   : > { %1043 = dma.hbm_to_vmem [thread:$0]  (!%p1455_p6), %s315_s20, 256, %s317_s19, [#allocation10], %s1354_s29, %s1354_s29, %s1355_s13  }
  0x1d   : > { %s1475_s25 = sadd.s32 1, %s1350_s12   ;;  %s34_s28 = sadd.s32 1, %s1346_s11 }
  0x1e   : > { %s31_s27 = ssub.s32 %s1350_s12, %s1475_s25  ;;  %p41_p8 = scmp.ne.s32.totalorder %s1346_s11, %s1342_s10 }
  0x1f   : > { %p32_p7 = scmp.eq.s32.totalorder %s31_s27, 0  ;;  %p42_p9 = scmp.eq.s32.totalorder %s1350_s12, 0 }
  0x20   : > { %p47_p10 = scmp.ne.s32.totalorder %s1342_s10, %s1338_s30  ;;  %p239_p13 = scmp.eq.s32.totalorder %s1438_s16, 1 }
  0x21   : > { %s1486_s26 = scalar_select %p32_p7, %s1346_s11, %s34_s28  }
  0x22   : > { %p1488_p11 = por %p42_p9, %p41_p8  ;;  %p1494_p12 = por %p48_p1, %p47_p10 }
  0x23   : > { %p245_p0 = scmp.eq.s32.totalorder %s939_s22, 1  ;;  %p1056_p2 = scmp.lt.s32.totalorder %s1350_s12, 2 }
  0x24   : > { %s333_s29 = sand.u32 1, %s1346_s11   ;;  %p1501_p4 = por %p239_p13, %p41_p8 }
  0x25   : > { %p1505_p6 = por %p245_p0, %p47_p10  ;;  %s946_s20 = sshll.u32 %s333_s29, 2 }
  0x26   : > { %s947_s21 = sshll.u32 %s1350_s12, 2  ;;  %s337_s27 = scalar_lea.vmem [#allocation3], %s946_s20 }
  0x27   : > { %s341_s19 = scalar_lea.hbm %s1632_s0, %s947_s21  ;;  %s345_s28 = sshll.u32 %s337_s27, 4  ;;  %s346_s28 = int_to_ptr.vmem [resolvable:$true] %s345_s28 }
  0x28   : > { %s343_s1 = sshll.u32 %s341_s19, 4  ;;  %p1515_p7 = pnand %p1056_p2, %p1488_p11  ;;  %s344_s1 = int_to_ptr.hbm [resolvable:$true] %s343_s1 }
  0x29   : > { %s334_s3 = scalar_lea.sflag [#allocation4], %s333_s29  ;;  %s1246_s5 = sshra.s32 %s344_s1, 4  ;;  %s1247_s5 = int_to_ptr.hbm [resolvable:$true] %s1246_s5 }
  0x2a   : > { %s1248_s7 = scalar_lea.hbm %s1247_s5, 4  ;;  %p1250_p9 = pneg %p1515_p7 }
  0x2b   : > { %p1249_p8 = scmp.ne.s32.totalorder %s1247_s5, %s1248_s7  ;;  %s1253_s24 = scalar_lea.hbm %s1632_s0, 8 }
  0x2c   : > { %p1254_p11 = scmp.lt.s32.totalorder %s1247_s5, %s1632_s0  ;;  %p1255_p0 = scmp.lt.s32.totalorder %s1253_s24, %s1248_s7 }
  0x2d   : > { %p1251_p10 = pnand %p1250_p9, %p1249_p8 }
  0x2e   : > { %p1256_p2 = por %p1255_p0, %p1254_p11 }
  0x2f   : > { %p1252_p13 = pneg %p1251_p10 }
  0x31   : > { %p1257_p5 = pnand %p1256_p2, %p1252_p13 }
  0x33   : > { %1260 = shalt.err (!%p1257_p5)
}
  0x34   : > { %1047 = dma.hbm_to_vmem [thread:$0]  (!%p1515_p7), %s344_s1, 64, %s346_s28, %s334_s3  }
  0x35   : > { %354 = sbr.rel (%p1443_p3) target bundleno = 1143 (0x477), region = 56  ;;  %s1532_s29 = sand.u32 (!%p1443_p3), 1, %s1342_s10  }
  0x36   : > { %s949_s19 = sshll.u32 (!%p1443_p3), %s1532_s29, 2  ;;  %s357_s27 = scalar_lea.sflag (!%p1443_p3), [#allocation4], %s1532_s29 }
  0x37   : > { %s360_s20 = scalar_lea.vmem (!%p1443_p3), [#allocation3], %s949_s19 }
  0x3a   : > { %1321 = dma.done.wait (%p1494_p12), %s357_s27, 64  }
  0x3b   : > { %1323 = vsyncadd (%p1494_p12), %s357_s27, 4294967232 }
  0x3c   : > { %1325 = dma.done.wait (%p48_p1), [#allocation7], 512  }
  0x3d   : > { %1327 = vsyncadd (%p48_p1), [#allocation7], 4294966784 }
  0x3e   : > { %1329 = dma.done.wait (%p48_p1), [#allocation10], 512  }
  0x3f   : > { %1331 = vsyncadd (%p48_p1), [#allocation10], 4294966784  ;;  %v1004_v0 = vld [vmem:[#allocation6 + $0x8] sm:$0xff]  ;;  %v1006_v1 = vld [vmem:[#allocation8 + $0x8] sm:$0xff]  ;;  %vm438_vm0 = vcmask 261120   ;;  %vm524_vm1 = vcmask 64512  }
  0x40   : > { %v1003_v2 = vld [vmem:[#allocation6] sm:$0xff]  ;;  %448 = vmatpush.bf16.msra.mxu0 %v1004_v0  ;;  %481 = vmatpush.bf16.msra.mxu1 %v1006_v1  ;;  %v1005_v3 = vld [vmem:[#allocation8] sm:$0xff]  ;;  %v417_v4 = vld [vmem:[%s360_s20] sm:$0xf]  ;;  %s1358_s17 = smov 112   ;;  %s1359_s23 = smov 120  }
  0x41   : > { %v1106_v5 = vld [vmem:[%s1634_s2] ss:$0 sm:$0xff]  ;;  %s1360_s28 = smov 104   ;;  %v1008_v20 = vld [vmem:[#allocation9 + $0x8] sm:$0xff]  ;;  %v1007_v33 = vld [vmem:[#allocation9] sm:$0xff]  ;;  %vm559_vm2 = vcmask 1043456  }
  0x42   : > { %v1107_v6 = vld [vmem:[%s1636_s4] ss:$0 sm:$0xff]  ;;  %514 = vmatpush.bf16.msra.mxu2 %v1008_v20  ;;  %vm577_vm3 = vcmask 60416   ;;  %s1361_s24 = smov 8   ;;  %s1362_s15 = smov 24   ;;  %vm649_vm4 = vcmask 126016  }
  0x43   : > { %v1108_v48 = vld [vmem:[%s1638_s6] ss:$0 sm:$0xff]  ;;  %s1363_s14 = smov 16   ;;  %vm712_vm5 = vcmask 191616   ;;  %vm775_vm6 = vcmask 257216   ;;  %s1000_s19 = sshll.u32 %s1438_s16, 3 }
  0x44   : > { %449 = vmatpush.bf16.msra.mxu0 %v1003_v2  ;;  %482 = vmatpush.bf16.msra.mxu1 %v1005_v3  ;;  %s954_s27 = sshll.u32 %s1532_s29, 3  ;;  %s826_s3 = scalar_lea.hbm %s1641_s9, %s1000_s19 }
  0x45   : > { %s816_s16 = scalar_lea.sflag [#allocation5], %s1532_s29 }
  0x46   : > { %515 = vmatpush.bf16.msra.mxu2 %v1007_v33 }
  0x47   : > { %963 = vmatmul.msk.bf16.vlgmr.msra.gmra.mxu0 %vm438_vm0, %v417_v4  ;;  %972 = vmatmul.msk.bf16.vlgmr.msra.gmra.mxu1 %vm438_vm0, %v417_v4 }
  0x49   : > { %981 = vmatmul.msk.bf16.vlgmr.msra.gmra.mxu2 %vm438_vm0, %v417_v4 }
  0xc4   : > { %v451_v7 = vpop.f32.mrf.mxu0  ;;  %v484_v8 = vpop.f32.mrf.mxu1 }
  0xc5   : > { %v452_v9 = vadd.f32 %v1106_v5, %v451_v7  ;;  %v485_v10 = vadd.f32 %v1107_v6, %v484_v8 }
  0xc7   : > { %v521_v11 = vpack.c.bf16 %v452_v9, %v452_v9  ;;  %v522_v12 = vpack.c.bf16 %v485_v10, %v485_v10 }
  0xc9   : > { %v580_v13 = vunpack.c.l.b16 %v521_v11  ;;  %v585_v14 = vunpack.c.l.b16 %v522_v12  ;;  %v529_v15 = vsel %vm524_vm1, %v522_v12, 0 }
  0xca   : > { %538 = vmatpush.bf16.xpose.msra.mxu3 %v529_v15 }
  0xcb   : > { %v581_v16 = vpack.c.b16 %v580_v13, %v580_v13  ;;  %v586_v17 = vpack.c.b16 %v585_v14, %v585_v14 }
  0xcc   : > { %v453_v18 = vpop.f32.mrf.mxu0  ;;  %v486_v19 = vpop.f32.mrf.mxu1 }
  0xcd   : > { %653 = vrot.lane.b32.xlu1 %v586_v17, %s1358_s17  ;;  %587 = vrot.lane.b32.xlu0 %v586_v17, %s1359_s23  ;;  %v517_v49 = vpop.f32.mrf.mxu2 }
  0xce   : > { %651 = vrot.lane.b32.xlu2 %v581_v16, %s1358_s17  ;;  %v518_v50 = vadd.f32 %v1108_v48, %v517_v49 }
  0xd0   : > { %v523_v51 = vpack.c.bf16 %v518_v50, %v518_v50 }
  0xd1   : > { %982 = vmatmul.msk.bf16.vlgmr.msra.gmra.mxu3 %vm524_vm1, %v521_v11 }
  0xd2   : > { %v621_v52 = vunpack.c.l.b16 %v523_v51  ;;  %v561_v53 = vsel %vm559_vm2, %v523_v51, 0 }
  0xd3   : > { %570 = vmatpush.bf16.msrb.mxu0 %v561_v53 }
  0xd4   : > { %v622_v54 = vpack.c.b16 %v621_v52, %v621_v52 }
  0xd5   : > { %716 = vrot.lane.b32.xlu1 %v586_v17, %s1360_s28  ;;  %582 = vrot.lane.b32.xlu0 %v581_v16, %s1359_s23  ;;  %v519_v55 = vpop.f32.mrf.mxu2 }
  0xd6   : > { %714 = vrot.lane.b32.xlu2 %v581_v16, %s1360_s28 }
 0x128   : > { %v652_v25 = vpop.permute.xlu2 %651 }
 0x130   : > { %v715_v31 = vpop.permute.xlu2 %714 }
 0x13f   : > { %v654_v21 = vpop.permute.xlu1 %653  ;;  %v588_v22 = vpop.permute.xlu0 %587 }
 0x140   : > { %v593_v23 = vsel %vm524_vm1, %v588_v22, 0  ;;  %v659_v24 = vsel %vm524_vm1, %v654_v21, 0 }
 0x141   : > { %602 = vmatpush.bf16.xpose.msrb.mxu1 %v593_v23  ;;  %668 = vmatpush.bf16.xpose.msrb.mxu3 %v659_v24 }
 0x147   : > { %v717_v26 = vpop.permute.xlu1 %716  ;;  %v583_v27 = vpop.permute.xlu0 %582 }
 0x148   : > { %v722_v28 = vsel %vm524_vm1, %v717_v26, 0  ;;  %984 = vmatmul.msk.bf16.vlgmr.msrb.gmra.mxu1 %vm524_vm1, %v583_v27  ;;  %986 = vmatmul.msk.bf16.vlgmr.msrb.gmra.mxu3 %vm524_vm1, %v652_v25 }
 0x149   : > { %731 = vmatpush.bf16.xpose.msra.mxu1 %v722_v28 }
 0x154   : > { %v540_v29 = vpop.f32.mrf.mxu3 }
 0x155   : > { %v544_v30 = vsel %vm524_vm1, %v540_v29, -inf }
 0x156   : > { %545 = vmax.xlane.f32.xlu1 %v544_v30 }
 0x158   : > { %988 = vmatmul.msk.bf16.vlgmr.msra.gmra.mxu1 %vm524_vm1, %v715_v31 }
 0x15c   : > { %v542_v32 = vpop.f32.mrf.mxu3 }
 0x1c5   : > { %v604_v34 = vpop.f32.mrf.mxu1 }
 0x1c6   : > { %v608_v35 = vsel %vm524_vm1, %v604_v34, -inf }
 0x1c7   : > { %609 = vmax.xlane.f32.xlu0 %v608_v35 }
 0x1c9   : > { %v546_v36 = vpop.xlane.xlu1 %545 }
 0x1ca   : > { %v547_v37 = vsub.f32 %v540_v29, %v546_v36 }
 0x1cb   : > { %v670_v38 = vpop.f32.mrf.mxu3 }
 0x1cc   : > { %v548_v39 = vmul.f32 1.442695, %v547_v37  ;;  %v674_v47 = vsel %vm524_vm1, %v670_v38, -inf }
 0x1cd   : > { %v606_v40 = vpop.f32.mrf.mxu1 }
 0x1ce   : > { %1110 = vpow2.f32 %v548_v39 }
 0x1d3   : > { %v672_v41 = vpop.f32.mrf.mxu3 }
 0x1d4   : > { %v1111_v42 = vpop.eup %1110 }
 0x1d5   : > { %v733_v43 = vpop.f32.mrf.mxu1  ;;  %v550_v44 = vsel %vm524_vm1, %v1111_v42, 0.0 }
 0x1d6   : > { %551 = vadd.xlane.f32.xlu1 %v550_v44  ;;  %v737_v45 = vsel %vm524_vm1, %v733_v43, -inf }
 0x1d7   : > { %738 = vmax.xlane.f32.xlu2 %v737_v45 }
 0x1dd   : > { %v735_v46 = vpop.f32.mrf.mxu1 }
 0x1df   : > { %675 = vmax.xlane.f32.xlu2 %v674_v47  ;;  %v1109_v47 = vld [vmem:[%s1640_s8] ss:$0 sm:$0xff] }
 0x1f7   : > { %623 = vrot.lane.b32.xlu2 %v622_v54, %s1359_s23 }
 0x23a   : > { %v610_v56 = vpop.xlane.xlu0 %609 }
 0x23b   : > { %v611_v57 = vsub.f32 %v604_v34, %v610_v56 }
 0x23d   : > { %v612_v58 = vmul.f32 1.442695, %v611_v57 }
 0x23f   : > { %1112 = vpow2.f32 %v612_v58 }
 0x245   : > { %v1113_v59 = vpop.eup %1112 }
 0x246   : > { %v614_v60 = vsel %vm524_vm1, %v1113_v59, 0.0 }
 0x247   : > { %615 = vadd.xlane.f32.xlu0 %v614_v60 }
 0x249   : > { %v552_v61 = vpop.xlane.xlu1 %551 }
 0x24a   : > { %1114 = vrcp.f32 %v552_v61  ;;  %v739_v62 = vpop.xlane.xlu2 %738 }
 0x24b   : > { %v740_v63 = vsub.f32 %v733_v43, %v739_v62  ;;  %v1009_v43 = vld [vmem:[#allocation11] sm:$0xff] }
 0x24d   : > { %v741_v0 = vmul.f32 1.442695, %v740_v63 }
 0x24f   : > { %1116 = vpow2.f32 %v741_v0 }
 0x250   : > { %v1115_v1 = vpop.eup %1114 }
 0x251   : > { %v554_v2 = vmul.f32 %v1115_v1, %v1111_v42  ;;  %v1010_v42 = vld [vmem:[#allocation11 + $0x8] sm:$0xff] }
 0x252   : > { %v676_v3 = vpop.xlane.xlu2 %675  ;;  %807 = vmatpush.bf16.msra.mxu3 %v1010_v42 }
 0x253   : > { %v677_v4 = vsub.f32 %v670_v38, %v676_v3  ;;  %v555_v5 = vpack.c.bf16 %v554_v2, %v554_v2 }
 0x255   : > { %v1117_v6 = vpop.eup %1116  ;;  %v678_v7 = vmul.f32 1.442695, %v677_v4  ;;  %983 = vmatmul.msk.bf16.vlgmr.msrb.gmra.mxu0 %vm524_vm1, %v555_v5 }
 0x256   : > { %v743_v8 = vsel %vm524_vm1, %v1117_v6, 0.0  ;;  %808 = vmatpush.bf16.msra.mxu3 %v1009_v43 }
 0x257   : > { %1118 = vpow2.f32 %v678_v7  ;;  %744 = vadd.xlane.f32.xlu0 %v743_v8 }
 0x25a   : > { %v624_v11 = vpop.permute.xlu2 %623 }
 0x25b   : > { %v629_v12 = vsel %vm559_vm2, %v624_v11, 0 }
 0x25c   : > { %638 = vmatpush.bf16.msrb.mxu2 %v629_v12 }
 0x25d   : > { %v1119_v9 = vpop.eup %1118 }
 0x25e   : > { %v680_v10 = vsel %vm524_vm1, %v1119_v9, 0.0 }
 0x25f   : > { %681 = vadd.xlane.f32.xlu1 %v680_v10 }
 0x26b   : > { %749 = vrot.lane.b32.xlu0 %v622_v54, %s1360_s28  ;;  %s830_s28 = sshll.u32 %s826_s3, 4  ;;  %s831_s28 = int_to_ptr.hbm [resolvable:$true] %s830_s28 }
 0x26c   : > { %s1290_s22 = sshra.s32 %s831_s28, 4  ;;  %s1291_s22 = int_to_ptr.hbm [resolvable:$true] %s1290_s22 }
 0x26d   : > { %s1292_s21 = scalar_lea.hbm %s1291_s22, 8  ;;  %p1297_p12 = scmp.lt.s32.totalorder %s1291_s22, %s1641_s9 }
 0x26e   : > { %p1293_p1 = scmp.ne.s32.totalorder %s1291_s22, %s1292_s21 }
 0x270   : > { %p1294_p3 = pnand %p1293_p1, %p1501_p4 }
 0x272   : > { %p1295_p5 = pneg %p1294_p3 }
 0x278   : > { %686 = vrot.lane.b32.xlu1 %v622_v54, %s1358_s17  ;;  %s415_s17 = scalar_lea.vmem [#allocation12], %s954_s27 }
 0x279   : > { %s828_s23 = sshll.u32 %s415_s17, 4  ;;  %s829_s23 = int_to_ptr.vmem [resolvable:$true] %s828_s23 }
 0x2ba   : > { %v616_v13 = vpop.xlane.xlu0 %615 }
 0x2bb   : > { %1120 = vrcp.f32 %v616_v13 }
 0x2c1   : > { %v1121_v14 = vpop.eup %1120 }
 0x2c2   : > { %v618_v15 = vmul.f32 %v1121_v14, %v1113_v59 }
 0x2c4   : > { %v619_v16 = vpack.c.bf16 %v618_v15, %v618_v15 }
 0x2c6   : > { %985 = vmatmul.msk.bf16.vlgmr.msrb.gmra.mxu2 %vm524_vm1, %v619_v16 }
 0x2ca   : > { %v745_v17 = vpop.xlane.xlu0 %744 }
 0x2cb   : > { %1122 = vrcp.f32 %v745_v17 }
 0x2d1   : > { %v1123_v20 = vpop.eup %1122 }
 0x2d2   : > { %v572_v18 = vpop.f32.mrf.mxu0  ;;  %v747_v22 = vmul.f32 %v1123_v20, %v1117_v6  ;;  %v682_v23 = vpop.xlane.xlu1 %681 }
 0x2d3   : > { %v576_v19 = vpack.c.bf16 %v572_v18, %v572_v18  ;;  %1124 = vrcp.f32 %v682_v23 }
 0x2d4   : > { %v748_v26 = vpack.c.bf16 %v747_v22, %v747_v22 }
 0x2d5   : > { %578 = vst.msk [vmem:[#allocation2] sm:$0xf] %vm577_vm3, %v576_v19 }
 0x2d9   : > { %v1125_v27 = vpop.eup %1124 }
 0x2da   : > { %v574_v21 = vpop.f32.mrf.mxu0  ;;  %v684_v28 = vmul.f32 %v1125_v27, %v1119_v9 }
 0x2dc   : > { %v685_v31 = vpack.c.bf16 %v684_v28, %v684_v28 }
 0x2dd   : > { %v750_v24 = vpop.permute.xlu0 %749 }
 0x2de   : > { %v755_v25 = vsel %vm559_vm2, %v750_v24, 0 }
 0x2df   : > { %764 = vmatpush.bf16.msra.mxu2 %v755_v25 }
 0x2e2   : > { %989 = vmatmul.msk.bf16.vlgmr.msra.gmra.mxu2 %vm524_vm1, %v748_v26 }
 0x2ea   : > { %v687_v29 = vpop.permute.xlu1 %686 }
 0x2eb   : > { %v692_v30 = vsel %vm559_vm2, %v687_v29, 0 }
 0x2ec   : > { %701 = vmatpush.bf16.msra.mxu0 %v692_v30 }
 0x2ef   : > { %987 = vmatmul.msk.bf16.vlgmr.msra.gmra.mxu0 %vm524_vm1, %v685_v31 }
 0x349   : > { %v640_v32 = vpop.f32.mrf.mxu2 }
 0x34a   : > { %v644_v33 = vpack.c.bf16 %v640_v32, %v640_v32 }
 0x34c   : > { %646 = vrot.lane.b32.xlu2 %v644_v33, %s1361_s24 }
 0x351   : > { %v642_v34 = vpop.f32.mrf.mxu2 }
 0x365   : > { %v766_v35 = vpop.f32.mrf.mxu2 }
 0x366   : > { %v770_v36 = vpack.c.bf16 %v766_v35, %v766_v35 }
 0x368   : > { %772 = vrot.lane.b32.xlu2 %v770_v36, %s1362_s15 }
 0x36c   : > { %v703_v37 = vpop.f32.mrf.mxu0 }
 0x36d   : > { %v707_v38 = vpack.c.bf16 %v703_v37, %v703_v37  ;;  %v768_v39 = vpop.f32.mrf.mxu2 }
 0x36f   : > { %709 = vrot.lane.b32.xlu0 %v707_v38, %s1363_s14  ;;  %s1296_s14 = scalar_lea.hbm %s1641_s9, 16 }
 0x370   : > { %p1298_p7 = scmp.lt.s32.totalorder %s1296_s14, %s1292_s21 }
 0x372   : > { %p1299_p8 = por %p1298_p7, %p1297_p12 }
 0x374   : > { %v705_v40 = vpop.f32.mrf.mxu0  ;;  %p1300_p9 = pnand %p1299_p8, %p1295_p5 }
 0x3a6   : > { %v647_v41 = vpop.permute.xlu2 %646 }
 0x3a7   : > { %650 = vst.msk [vmem:[#allocation2] sm:$0xf] %vm649_vm4, %v647_v41 }
 0x3c2   : > { %v773_v45 = vpop.permute.xlu2 %772 }
 0x3e1   : > { %v710_v44 = vpop.permute.xlu0 %709 }
 0x3e2   : > { %713 = vst.msk [vmem:[#allocation2] sm:$0xf] %vm712_vm5, %v710_v44 }
 0x3e3   : > { %776 = vst.msk [vmem:[#allocation2] sm:$0xf] %vm775_vm6, %v773_v45 }
 0x3ea   : > { %v777_v46 = vld [vmem:[#allocation2] sm:$0xf] }
 0x3eb   : > { %998 = vmatmul.msk.bf16.vlgmr.msra.gmra.mxu3 %vm438_vm0, %v777_v46 }
 0x46e   : > { %v810_v48 = vpop.f32.mrf.mxu3 }
 0x46f   : > { %v811_v49 = vadd.f32 %v1109_v47, %v810_v48 }
 0x471   : > { %814 = vst.msk [vmem:[%s415_s17] sm:$0xff] %vm438_vm0, %v811_v49 }
 0x472   : > { %1303 = shalt.err (!%p1300_p9)
}
 0x473   : > { %1029 = dma.vmem_to_hbm [thread:$0]  (%p1501_p4), %s829_s23, 128, %s831_s28, %s816_s16  }
 0x476   : > { %v812_v50 = vpop.f32.mrf.mxu3 }
 0x477 PF: > { %s842_s29 = sand.u32 1, %s1338_s30   ;;  %p1657_p10 = scmp.ge.s32.totalorder %s1350_s12, 2 }
 0x478   : > { %s843_s20 = scalar_lea.sflag [#allocation5], %s842_s29 }
 0x479   : > { %p1049_p13 = pnand %p1657_p10, %p1505_p6 }
 0x47b   : > { %p1050_p11 = pneg %p1049_p13 }
 0x47d   : > { %1333 = dma.done.wait (%p1050_p11), %s843_s20, 128  }
 0x47e   : > { %1335 = vsyncadd (%p1050_p11), %s843_s20, 4294967168  ;;  %p24_p0 = scmp.ge.s32.totalorder %s1475_s25, 4   ;;  %s1658_s30 = smov %s1342_s10 }
 0x47f   : > { %s1659_s10 = smov %s1346_s11  ;;  %s1660_s11 = smov %s1486_s26 }
 0x480   : > { %s1661_s12 = smov %s1475_s25  ;;  %26 = sbr.rel (!%p24_p0) target bundleno = 12 (0xc), region = 117 }
 0x485   :  { %849 = vsyncpa [#allocation4], 1 }
 0x486   :  { %851 = vsyncpa [#allocation4 + $0x1], 1 }
 0x487   :  { %852 = vsyncpa [#allocation7], 1 }
 0x488   :  { %853 = vsyncpa [#allocation10], 1 }
 0x489   :  { %854 = vsyncpa [#allocation5], 1 }
 0x48a   :  { %856 = vsyncpa [#allocation5 + $0x1], 1 }

</bundles_post_ra>
